<compile_context>
chip_gen: v7x
topology: tpu7x:2x2x1
jax: 0.10.0
libtpu: 0.0.40
codegen_flags: <defaults>
</compile_context>

<pallas_src>
import jax
import jax.numpy as jnp
from jax.experimental import pallas as pl
from jax.experimental.pallas import tpu as pltpu

LANE = 128     # TPU lane width; hidden dims (50/20) are zero-padded to this.
OUT_PAD = 8    # stored output width (>= 4 real logits); lane-narrow f32 store.


def _mlp_kernel(x_ref, w1_ref, w2_ref, w3_ref, b_ref, o_ref):
    # x_ref: (tm, C) f32; w*_ref: lane-padded bf16; b_ref: (3, 128) f32;
    # o_ref: (tm, OUT_PAD) f32.
    x = x_ref[...].astype(jnp.bfloat16)   # in-kernel cast: no extra HBM pass

    b1 = b_ref[0:1, :]
    b2 = b_ref[1:2, :]
    b3 = b_ref[2:3, :]

    h1 = jnp.dot(x, w1_ref[...], preferred_element_type=jnp.float32) + b1
    h1 = jnp.maximum(h1, 0.0).astype(jnp.bfloat16)

    h2 = jnp.dot(h1, w2_ref[...], preferred_element_type=jnp.float32) + b2
    h2 = jnp.maximum(h2, 0.0).astype(jnp.bfloat16)

    out = jnp.dot(h2, w3_ref[...], preferred_element_type=jnp.float32) + b3
    # Matmul stays 128 lanes wide in-register; only the first OUT_PAD lanes
    # (real logits live in [:4]) are written back -> minimal HBM write bytes.
    o_ref[...] = out[:, :OUT_PAD]


def prepare_params(params):
    """One-time parameter prep (hoisted out of the per-call path):
    lane-pad weights to 128, cast to bf16, pack the 3 biases into one (3,128)
    f32 tile.  Zero padding keeps the padded math exactly equal to unpadded."""
    w1, b1 = params["w1"], params["b1"]
    w2, b2 = params["w2"], params["b2"]
    w3, b3 = params["w3"], params["b3"]
    C, H1 = w1.shape
    H2, OUT = w2.shape[1], w3.shape[1]
    assert OUT <= OUT_PAD <= LANE and H1 <= LANE and H2 <= LANE

    def pad2(a, shape):
        buf = jnp.zeros(shape, jnp.float32)
        return buf.at[: a.shape[0], : a.shape[1]].set(a.astype(jnp.float32))

    prepared = dict(params)  # keep originals for the small-batch XLA fallback
    prepared["w1p"] = pad2(w1, (C, LANE)).astype(jnp.bfloat16)
    prepared["w2p"] = pad2(w2, (LANE, LANE)).astype(jnp.bfloat16)
    prepared["w3p"] = pad2(w3, (LANE, LANE)).astype(jnp.bfloat16)

    bias = jnp.zeros((3, LANE), jnp.float32)
    bias = bias.at[0, :H1].set(b1.reshape(-1).astype(jnp.float32))
    bias = bias.at[1, :H2].set(b2.reshape(-1).astype(jnp.float32))
    bias = bias.at[2, :OUT].set(b3.reshape(-1).astype(jnp.float32))
    prepared["bias"] = bias
    prepared["out_dim"] = OUT
    return prepared


def _round_up(v, m):
    return ((v + m - 1) // m) * m


def _default_tm(B):
    # Small B: one full-extent tile (block dim == array dim is always legal).
    if B <= 256:
        return B
    # Aim for ~8 grid steps (pipelined x/out DMA, 2-TC sharding on v7x) with
    # tiles in [256, 1024]; working set stays ~1-2 MiB << scoped-VMEM limits.
    return max(256, min(1024, _round_up(pl.cdiv(B, 8), 256)))


def classifier_forward(x, prepared, *, tm=None, min_pallas_batch=256):
    """3-layer MLP forward.  x: [B, C] f32; prepared = prepare_params(params).
    Returns [B, 4] f32."""
    B, C = x.shape
    OUT = prepared["out_dim"]

    if B < min_pallas_batch:
        # Tiny batches are launch/DMA-setup bound in the kernel; plain XLA
        # (exact f32 module semantics) wins here.
        h = jnp.maximum(x @ prepared["w1"] + prepared["b1"], 0.0)
        h = jnp.maximum(h @ prepared["w2"] + prepared["b2"], 0.0)
        return h @ prepared["w3"] + prepared["b3"]

    w1p, w2p, w3p, bias = (prepared["w1p"], prepared["w2p"],
                           prepared["w3p"], prepared["bias"])

    if tm is None:
        tm = _default_tm(B)
    grid = (pl.cdiv(B, tm),)  # ragged last tile: OOB rows read undefined data
                              # but rows are independent and writeback is masked.

    # Weights/biases are full-extent blocks resident across all grid steps.
    full = lambda shape: pl.BlockSpec(shape, lambda i: (0,) * len(shape))

    cost = pl.CostEstimate(
        flops=2 * B * LANE * (C + 2 * LANE),
        transcendentals=0,
        bytes_accessed=int(B * C * 4 + B * OUT_PAD * 4
                           + (w1p.size + w2p.size + w3p.size) * 2
                           + bias.size * 4),
    )

    out = pl.pallas_call(
        _mlp_kernel,
        out_shape=jax.ShapeDtypeStruct((B, OUT_PAD), jnp.float32),
        grid_spec=pl.GridSpec(
            grid=grid,
            in_specs=[
                pl.BlockSpec((tm, C), lambda i: (i, 0)),  # batch-tiled x (f32)
                full((C, LANE)),                          # fc1 weight (bf16)
                full((LANE, LANE)),                       # fc2 weight (bf16)
                full((LANE, LANE)),                       # fc3 weight (bf16)
                full((3, LANE)),                          # packed biases (f32)
            ],
            out_specs=pl.BlockSpec((tm, OUT_PAD), lambda i: (i, 0)),
        ),
        compiler_params=pltpu.CompilerParams(
            dimension_semantics=("parallel",),
        ),
        cost_estimate=cost,
    )(x.astype(jnp.float32), w1p, w2p, w3p, bias)

    return out[:, :OUT]  # trivial (B,8)->(B,4) slice


def init_params(key, input_channel):
    """Deterministic synthetic init matching nn.Linear shapes.
    PyTorch stores weight as [out, in]; we keep the transposed [in, out] form."""
    dims = [(input_channel, 50), (50, 20), (20, 4)]
    params = {}
    for idx, (fan_in, fan_out) in enumerate(dims, start=1):
        key, kw, kb = jax.random.split(key, 3)
        bound = 1.0 / jnp.sqrt(fan_in)
        params[f"w{idx}"] = jax.random.uniform(
            kw, (fan_in, fan_out), jnp.float32, -bound, bound)
        params[f"b{idx}"] = jax.random.uniform(
            kb, (1, fan_out), jnp.float32, -bound, bound)
    return params


if __name__ == "__main__":
    key = jax.random.PRNGKey(0)
    B, C = 8, 32  # small shapes: batch=8, input_channel=32

    key, kx = jax.random.split(key)
    x = jax.random.normal(kx, (B, C), dtype=jnp.float32)
    params = init_params(key, C)
    prepared = prepare_params(params)   # one-time prep (hoisted out of calls)

    # Force the Pallas path even at this tiny batch (the default dispatch would
    # route B=8 to the XLA fallback).
    out = classifier_forward(x, prepared, min_pallas_batch=0)
    out = jax.block_until_ready(out)
    assert out.shape == (B, 4)

    # Also exercise a multi-step grid with a ragged last tile (masked writeback).
    xb2 = jax.random.normal(jax.random.PRNGKey(1), (40, C), dtype=jnp.float32)
    out2 = classifier_forward(xb2, prepared, tm=16, min_pallas_batch=0)
    out2 = jax.block_until_ready(out2)
    assert out2.shape == (40, 4)

    # Reference 1: bf16-input / f32-accumulate forward (matches kernel numerics).
    def ref_bf16(xv, p):
        h = jnp.dot(xv.astype(jnp.bfloat16), p["w1"].astype(jnp.bfloat16),
                    preferred_element_type=jnp.float32) + p["b1"]
        h = jnp.maximum(h, 0.0)
        h = jnp.dot(h.astype(jnp.bfloat16), p["w2"].astype(jnp.bfloat16),
                    preferred_element_type=jnp.float32) + p["b2"]
        h = jnp.maximum(h, 0.0)
        return jnp.dot(h.astype(jnp.bfloat16), p["w3"].astype(jnp.bfloat16),
                       preferred_element_type=jnp.float32) + p["b3"]

    assert jnp.allclose(out, ref_bf16(x, params), atol=1e-3, rtol=1e-3)
    assert jnp.allclose(out2, ref_bf16(xb2, params), atol=1e-3, rtol=1e-3)

    # Reference 2: full f32 forward (module semantics); loose tolerance because
    # the kernel feeds the MXU bf16 inputs (f32 accumulation).
    def ref_f32(xv, p):
        h = jnp.maximum(xv @ p["w1"] + p["b1"], 0.0)
        h = jnp.maximum(h @ p["w2"] + p["b2"], 0.0)
        return h @ p["w3"] + p["b3"]

    assert jnp.allclose(out, ref_f32(x, params), atol=3e-2, rtol=3e-2)

    # The small-batch XLA fallback path (default dispatch) must agree too.
    out_xla = classifier_forward(x, prepared)
    assert jnp.allclose(out_xla, ref_f32(x, params), atol=1e-5, rtol=1e-5)

    print("KERNEL_OK")
</pallas_src>

<mosaic_0001>
module attributes {stable_mosaic.version = 11 : i64} {
  func.func @_mlp_kernel(%arg0: i32, %arg1: memref<8x32xf32, #tpu.memory_space<vmem>>, %arg2: memref<32x128xbf16, #tpu.memory_space<vmem>>, %arg3: memref<128x128xbf16, #tpu.memory_space<vmem>>, %arg4: memref<128x128xbf16, #tpu.memory_space<vmem>>, %arg5: memref<3x128xf32, #tpu.memory_space<vmem>>, %arg6: memref<8x8xf32, #tpu.memory_space<vmem>>) attributes {dimension_semantics = [#tpu.dimension_semantics<parallel>], iteration_bounds = array<i64: 1>, scalar_prefetch = 0 : i64, scratch_operands = 0 : i64, tpu.core_type = #tpu.core_type<tc>, window_params = [{transform_indices = @transform_0, window_bounds = array<i64: 8, 32>}, {pipeline_mode = #tpu.pipeline_mode<synchronous>, transform_indices = @transform_1, window_bounds = array<i64: 32, 128>}, {pipeline_mode = #tpu.pipeline_mode<synchronous>, transform_indices = @transform_2, window_bounds = array<i64: 128, 128>}, {pipeline_mode = #tpu.pipeline_mode<synchronous>, transform_indices = @transform_3, window_bounds = array<i64: 128, 128>}, {pipeline_mode = #tpu.pipeline_mode<synchronous>, transform_indices = @transform_4, window_bounds = array<i64: 3, 128>}, {transform_indices = @transform_5, window_bounds = array<i64: 8, 8>}]} {
    %c0 = arith.constant 0 : index
    %c0_0 = arith.constant 0 : index
    %0 = vector.load %arg1[%c0, %c0_0] : memref<8x32xf32, #tpu.memory_space<vmem>>, vector<8x32xf32>
    %1 = arith.truncf %0 : vector<8x32xf32> to vector<8x32xbf16>
    %c0_1 = arith.constant 0 : index
    %c0_2 = arith.constant 0 : index
    %2 = vector.load %arg5[%c0_1, %c0_2] : memref<3x128xf32, #tpu.memory_space<vmem>>, vector<1x128xf32>
    %c1 = arith.constant 1 : index
    %c0_3 = arith.constant 0 : index
    %3 = vector.load %arg5[%c1, %c0_3] : memref<3x128xf32, #tpu.memory_space<vmem>>, vector<1x128xf32>
    %c2 = arith.constant 2 : index
    %c0_4 = arith.constant 0 : index
    %4 = vector.load %arg5[%c2, %c0_4] : memref<3x128xf32, #tpu.memory_space<vmem>>, vector<1x128xf32>
    %c0_5 = arith.constant 0 : index
    %c0_6 = arith.constant 0 : index
    %5 = vector.load %arg2[%c0_5, %c0_6] : memref<32x128xbf16, #tpu.memory_space<vmem>>, vector<32x128xbf16>
    %cst = arith.constant dense<0.000000e+00> : vector<8x128xf32>
    %6 = tpu.matmul %1, %5, %cst {dimension_numbers = #tpu.dot_dimension_numbers<[1], [0], [0], [1], [0, 0, 1, 1], [], []>} : vector<8x32xbf16>, vector<32x128xbf16>, vector<8x128xf32> -> vector<8x128xf32>
    %7 = vector.broadcast %2 : vector<1x128xf32> to vector<8x128xf32>
    %8 = arith.addf %6, %7 : vector<8x128xf32>
    %cst_7 = arith.constant 0.000000e+00 : f32
    %9 = vector.broadcast %cst_7 : f32 to vector<8x128xf32>
    %10 = arith.maximumf %8, %9 : vector<8x128xf32>
    %11 = arith.truncf %10 : vector<8x128xf32> to vector<8x128xbf16>
    %c0_8 = arith.constant 0 : index
    %c0_9 = arith.constant 0 : index
    %12 = vector.load %arg3[%c0_8, %c0_9] : memref<128x128xbf16, #tpu.memory_space<vmem>>, vector<128x128xbf16>
    %cst_10 = arith.constant dense<0.000000e+00> : vector<8x128xf32>
    %13 = tpu.matmul %11, %12, %cst_10 {dimension_numbers = #tpu.dot_dimension_numbers<[1], [0], [0], [1], [0, 0, 1, 1], [], []>} : vector<8x128xbf16>, vector<128x128xbf16>, vector<8x128xf32> -> vector<8x128xf32>
    %14 = vector.broadcast %3 : vector<1x128xf32> to vector<8x128xf32>
    %15 = arith.addf %13, %14 : vector<8x128xf32>
    %cst_11 = arith.constant 0.000000e+00 : f32
    %16 = vector.broadcast %cst_11 : f32 to vector<8x128xf32>
    %17 = arith.maximumf %15, %16 : vector<8x128xf32>
    %18 = arith.truncf %17 : vector<8x128xf32> to vector<8x128xbf16>
    %c0_12 = arith.constant 0 : index
    %c0_13 = arith.constant 0 : index
    %19 = vector.load %arg4[%c0_12, %c0_13] : memref<128x128xbf16, #tpu.memory_space<vmem>>, vector<128x128xbf16>
    %cst_14 = arith.constant dense<0.000000e+00> : vector<8x128xf32>
    %20 = tpu.matmul %18, %19, %cst_14 {dimension_numbers = #tpu.dot_dimension_numbers<[1], [0], [0], [1], [0, 0, 1, 1], [], []>} : vector<8x128xbf16>, vector<128x128xbf16>, vector<8x128xf32> -> vector<8x128xf32>
    %21 = vector.broadcast %4 : vector<1x128xf32> to vector<8x128xf32>
    %22 = arith.addf %20, %21 : vector<8x128xf32>
    %23 = vector.extract_strided_slice %22 {offsets = [0, 0], sizes = [8, 8], strides = [1, 1]} : vector<8x128xf32> to vector<8x8xf32>
    %c0_15 = arith.constant 0 : index
    %c0_16 = arith.constant 0 : index
    %24 = vector.load %arg6[%c0_15, %c0_16] : memref<8x8xf32, #tpu.memory_space<vmem>>, vector<8x8xf32>
    tpu.vector_store %arg6[%c0_15, %c0_16], %23 {strides = array<i32>} : memref<8x8xf32, #tpu.memory_space<vmem>>, vector<8x8xf32>,
    return
  }
  func.func @transform_0(%arg0: i32) -> (i32, i32) {
    %c0_i32 = arith.constant 0 : i32
    %c0_i32_0 = arith.constant 0 : i32
    return %arg0, %c0_i32 : i32, i32
  }
  func.func @transform_1(%arg0: i32) -> (i32, i32) {
    %c0_i32 = arith.constant 0 : i32
    %c0_i32_0 = arith.constant 0 : i32
    %c0_i32_1 = arith.constant 0 : i32
    return %c0_i32, %c0_i32_0 : i32, i32
  }
  func.func @transform_2(%arg0: i32) -> (i32, i32) {
    %c0_i32 = arith.constant 0 : i32
    %c0_i32_0 = arith.constant 0 : i32
    %c0_i32_1 = arith.constant 0 : i32
    return %c0_i32, %c0_i32_0 : i32, i32
  }
  func.func @transform_3(%arg0: i32) -> (i32, i32) {
    %c0_i32 = arith.constant 0 : i32
    %c0_i32_0 = arith.constant 0 : i32
    %c0_i32_1 = arith.constant 0 : i32
    return %c0_i32, %c0_i32_0 : i32, i32
  }
  func.func @transform_4(%arg0: i32) -> (i32, i32) {
    %c0_i32 = arith.constant 0 : i32
    %c0_i32_0 = arith.constant 0 : i32
    %c0_i32_1 = arith.constant 0 : i32
    return %c0_i32, %c0_i32_0 : i32, i32
  }
  func.func @transform_5(%arg0: i32) -> (i32, i32) {
    %c0_i32 = arith.constant 0 : i32
    %c0_i32_0 = arith.constant 0 : i32
    return %arg0, %c0_i32 : i32, i32
  }
}

</mosaic_0001>

<bundles_post_ra>
// kernel: tpu_custom_call.1
= control target key start
LH: loop header
LB: loop body
LE: loop exit
PB: predicated region body
PF: predicated region fallthrough
CT: control target
= control target key end

     0   :  { %10 = vsyncpa [#allocation3], 0  ;;  %s760_s0 = inlined_call_operand.hbm [shape: f32[8,32], index: 0, kind: input, shape index: {}]   ;;  %s761_s1 = inlined_call_operand.hbm [shape: bf16[32,128], index: 1, kind: input, shape index: {}]   ;;  %s762_s2 = inlined_call_operand.hbm [shape: bf16[128,128], index: 2, kind: input, shape index: {}]   ;;  %s763_s3 = inlined_call_operand.hbm [shape: bf16[128,128], index: 3, kind: input, shape index: {}]   ;;  %s764_s4 = inlined_call_operand.vmem [shape: f32[3,128], index: 4, kind: input, shape index: {}]   ;;  %s765_s5 = inlined_call_operand.hbm [shape: f32[8,8], index: 5, kind: output, shape index: {}]  }
   0x1   :  { %11 = vsyncpa [#allocation6], 0 }
   0x2   :  { %12 = vsyncpa [#allocation9], 0 }
   0x3   :  { %13 = vsyncpa [#allocation4], 0  ;;  %s619_s18 = smov [#allocation5]   ;;  %s501_s22 = scalar_lea.hbm %s761_s1, 256 }
   0x4   :  { %s29_s19 = sshll.u32 %s619_s18, 4  ;;  %p502_p0 = scmp.ne.s32.totalorder %s761_s1, %s501_s22  ;;  %s30_s19 = int_to_ptr.vmem [resolvable:$true] %s29_s19 }
   0x5   :  { %p505_p1 = scmp.lt.u32.totalorder %s501_s22, %s761_s1 }
   0x7   :  { %p507_p2 = pnand %p505_p1, %p502_p0 }
   0x9   :  { %510 = shalt.err (!%p507_p2)
}
   0xa   :  { %s511_s27 = scalar_lea.vmem %s30_s19, 256  ;;  %p516_p4 = scmp.lt.s32.totalorder %s30_s19, %s30_s19 }
   0xb   :  { %p512_p3 = scmp.ne.s32.totalorder %s30_s19, %s511_s27  ;;  %p517_p5 = scmp.lt.s32.totalorder %s511_s27, %s511_s27 }
   0xd   :  { %p518_p6 = por %p517_p5, %p516_p4 }
   0xf   :  { %p519_p7 = pnand %p518_p6, %p512_p3 }
  0x11   :  { %522 = shalt.err (!%p519_p7)
}
  0x12   :  { %s620_s28 = smov 64   ;;  %s621_s29 = smov 4  }
  0x13   :  { %35 = dma.hbm_to_vmem [thread:$0]  %s761_s1, 256, %s30_s19, [#allocation6], %s620_s28, %s620_s28, %s621_s29  }
  0x14   :  { %s622_s7 = smov [#allocation2]   ;;  %s623_s9 = smov [#allocation7]  }
  0x15   :  { %s20_s8 = sshll.u32 %s622_s7, 4  ;;  %s41_s10 = sshll.u32 %s623_s9, 4  ;;  %s21_s8 = int_to_ptr.vmem [resolvable:$true] %s20_s8  ;;  %s42_s10 = int_to_ptr.vmem [resolvable:$true] %s41_s10 }
  0x16   :  { %s523_s13 = scalar_lea.hbm %s760_s0, 128 }
  0x17   :  { %p524_p8 = scmp.ne.s32.totalorder %s760_s0, %s523_s13  ;;  %p527_p9 = scmp.lt.u32.totalorder %s523_s13, %s760_s0 }
  0x19   :  { %p529_p10 = pnand %p527_p9, %p524_p8 }
  0x1b   :  { %532 = shalt.err (!%p529_p10)
}
  0x1c   :  { %s533_s1 = scalar_lea.vmem %s21_s8, 128  ;;  %p538_p12 = scmp.lt.s32.totalorder %s21_s8, %s21_s8 }
  0x1d   :  { %p534_p11 = scmp.ne.s32.totalorder %s21_s8, %s533_s1  ;;  %p539_p13 = scmp.lt.s32.totalorder %s533_s1, %s533_s1 }
  0x1f   :  { %p540_p0 = por %p539_p13, %p538_p12 }
  0x21   :  { %p541_p1 = pnand %p540_p0, %p534_p11 }
  0x23   :  { %544 = shalt.err (!%p541_p1)
}
  0x24   :  { %23 = dma.hbm_to_vmem [thread:$0]  %s760_s0, 128, %s21_s8, [#allocation3]  }
  0x25   :  { %s545_s22 = scalar_lea.hbm %s762_s2, 1024 }
  0x26   :  { %p546_p2 = scmp.ne.s32.totalorder %s762_s2, %s545_s22  ;;  %p549_p3 = scmp.lt.u32.totalorder %s545_s22, %s762_s2 }
  0x28   :  { %p551_p4 = pnand %p549_p3, %p546_p2 }
  0x2a   :  { %554 = shalt.err (!%p551_p4)
}
  0x2b   :  { %s555_s27 = scalar_lea.vmem %s42_s10, 1024  ;;  %p560_p6 = scmp.lt.s32.totalorder %s42_s10, %s42_s10 }
  0x2c   :  { %p556_p5 = scmp.ne.s32.totalorder %s42_s10, %s555_s27  ;;  %p561_p7 = scmp.lt.s32.totalorder %s555_s27, %s555_s27 }
  0x2e   :  { %p562_p8 = por %p561_p7, %p560_p6 }
  0x30   :  { %p563_p9 = pnand %p562_p8, %p556_p5 }
  0x32   :  { %566 = shalt.err (!%p563_p9)
}
  0x33   :  { %47 = dma.hbm_to_vmem [thread:$0]  %s762_s2, 1024, %s42_s10, [#allocation6], %s620_s28, %s620_s28, %s621_s29  }
  0x34   :  { %s624_s6 = smov [#allocation8]   ;;  %s567_s11 = scalar_lea.hbm %s763_s3, 1024 }
  0x35   :  { %s53_s7 = sshll.u32 %s624_s6, 4  ;;  %p568_p10 = scmp.ne.s32.totalorder %s763_s3, %s567_s11  ;;  %s54_s7 = int_to_ptr.vmem [resolvable:$true] %s53_s7 }
  0x36   :  { %p571_p11 = scmp.lt.u32.totalorder %s567_s11, %s763_s3 }
  0x38   :  { %p573_p12 = pnand %p571_p11, %p568_p10 }
  0x3a   :  { %576 = shalt.err (!%p573_p12)
}
  0x3b   :  { %s577_s16 = scalar_lea.vmem %s54_s7, 1024  ;;  %p582_p0 = scmp.lt.s32.totalorder %s54_s7, %s54_s7 }
  0x3c   :  { %p578_p13 = scmp.ne.s32.totalorder %s54_s7, %s577_s16  ;;  %p583_p1 = scmp.lt.s32.totalorder %s577_s16, %s577_s16 }
  0x3e   :  { %p584_p2 = por %p583_p1, %p582_p0 }
  0x40   :  { %p585_p3 = pnand %p584_p2, %p578_p13 }
  0x42   :  { %588 = shalt.err (!%p585_p3)
}
  0x43   :  { %59 = dma.hbm_to_vmem [thread:$0]  %s763_s3, 1024, %s54_s7, [#allocation9], %s620_s28, %s620_s28, %s621_s29  }
  0x44   :  { %611 = dma.done.wait [#allocation3], 128  }
  0x45   :  { %612 = vsyncadd [#allocation3], 4294967168 }
  0x46   :  { %613 = dma.done.wait [#allocation6], 1280  }
  0x47   :  { %614 = vsyncadd [#allocation6], 4294966016 }
  0x48   :  { %615 = dma.done.wait [#allocation9], 1024  }
  0x49   :  { %616 = vsyncadd [#allocation9], 4294966272  ;;  %v625_v0 = vmov 0.0   ;;  %vm626_vm0 = vmmov 0   ;;  %v483_v1 = vld [vmem:[#allocation5] sm:$0xff]   ;;  %v484_v2 = vld [vmem:[#allocation5 + $0x8] sm:$0xff]  }
  0x4a   :  { %426 = vmatprep.subr.bf16.mxu0 %v625_v0  ;;  %430 = vmatprep.mubr.msk.bf16.mxu0 %vm626_vm0, %v625_v0  ;;  %v75_v3 = vld [vmem:[#allocation2] sm:$0xff]  ;;  %v485_v4 = vld [vmem:[#allocation7] sm:$0xff]   ;;  %vm100_vm1 = vcmask 261120   ;;  %v487_v7 = vld [vmem:[#allocation7 + $0x10] sm:$0xff]   ;;  %s627_s19 = smov [#allocation10]   ;;  %vm364_vm2 = vcmask 64512  }
  0x4b   :  { %434 = vmatprep.subr.bf16.mxu1 %v625_v0  ;;  %450 = vmatprep.mubr.msk.bf16.mxu1 %vm626_vm0, %v625_v0  ;;  %v76_v5 = vpack.c.bf16 %v75_v3, %v75_v3  ;;  %v486_v6 = vld [vmem:[#allocation7 + $0x8] sm:$0xff]   ;;  %v488_v8 = vld [vmem:[#allocation7 + $0x18] sm:$0xff]   ;;  %v489_v9 = vld [vmem:[#allocation7 + $0x20] sm:$0xff]   ;;  %s372_s20 = sshll.u32 %s627_s19, 4  ;;  %s373_s20 = int_to_ptr.vmem [resolvable:$true] %s372_s20 }
  0x4c   :  { %427 = vmatpush3.bf16.msra.mxu0 %v483_v1  ;;  %435 = vmatpush3.bf16.msra.mxu1 %v485_v4  ;;  %v490_v10 = vld [vmem:[#allocation7 + $0x28] sm:$0xff]   ;;  %v491_v11 = vld [vmem:[#allocation7 + $0x30] sm:$0xff]   ;;  %v492_v12 = vld [vmem:[#allocation7 + $0x38] sm:$0xff]   ;;  %s589_s21 = scalar_lea.vmem %s373_s20, 128  ;;  %p594_p5 = scmp.lt.s32.totalorder %s373_s20, %s373_s20 }
  0x4d   :  { %428 = vmatprep.subr.bf16.mxu0 %v625_v0  ;;  %436 = vmatprep.subr.bf16.mxu1 %v625_v0  ;;  %v493_v13 = vld [vmem:[#allocation8] sm:$0xff]   ;;  %v494_v14 = vld [vmem:[#allocation8 + $0x8] sm:$0xff]   ;;  %v495_v15 = vld [vmem:[#allocation8 + $0x10] sm:$0xff]   ;;  %p590_p4 = scmp.ne.s32.totalorder %s373_s20, %s589_s21  ;;  %p595_p6 = scmp.lt.s32.totalorder %s589_s21, %s589_s21 }
  0x4e   :  { %v496_v16 = vld [vmem:[#allocation8 + $0x18] sm:$0xff]   ;;  %v497_v17 = vld [vmem:[#allocation8 + $0x20] sm:$0xff]   ;;  %v498_v18 = vld [vmem:[#allocation8 + $0x28] sm:$0xff]  }
  0x4f   :  { %v383_v19 = vld [vmem:[%s764_s4] ss:$0 sm:$0xff]  ;;  %v499_v27 = vld [vmem:[#allocation8 + $0x30] sm:$0xff]   ;;  %v500_v28 = vld [vmem:[#allocation8 + $0x38] sm:$0xff]   ;;  %p596_p7 = por %p595_p6, %p594_p5 }
  0x50   :  { %429 = vmatpush3.bf16.msra.mxu0 %v484_v2  ;;  %437 = vmatpush3.bf16.msra.mxu1 %v486_v6  ;;  %v387_v29 = vld [vmem:[%s764_s4 + $0x1] ss:$0 sm:$0xff]  ;;  %v396_v37 = vld [vmem:[%s764_s4 + $0x2] ss:$0 sm:$0xff] }
  0x51   :  { %454 = vmatprep.subr.bf16.mxu0 %v625_v0  ;;  %438 = vmatprep.subr.bf16.mxu1 %v625_v0  ;;  %p597_p8 = pnand %p596_p7, %p590_p4 }
  0x53   :  { %431 = vmatmul.mubr.msk.bf16.vlgmr.msra.gmra.mrb[0].mxu0 %vm100_vm1, %v76_v5 }
  0x54   :  { %470 = vmatprep.mubr.msk.bf16.mxu0 %vm626_vm0, %v625_v0  ;;  %439 = vmatpush3.bf16.msra.mxu1 %v487_v7 }
  0x55   :  { %440 = vmatprep.subr.bf16.mxu1 %v625_v0  ;;  %455 = vmatpush3.bf16.msra.mxu0 %v493_v13 }
  0x56   :  { %456 = vmatprep.subr.bf16.mxu0 %v625_v0 }
  0x58   :  { %441 = vmatpush3.bf16.msra.mxu1 %v488_v8 }
  0x59   :  { %442 = vmatprep.subr.bf16.mxu1 %v625_v0  ;;  %457 = vmatpush3.bf16.msra.mxu0 %v494_v14 }
  0x5a   :  { %458 = vmatprep.subr.bf16.mxu0 %v625_v0 }
  0x5c   :  { %443 = vmatpush3.bf16.msra.mxu1 %v489_v9 }
  0x5d   :  { %444 = vmatprep.subr.bf16.mxu1 %v625_v0  ;;  %459 = vmatpush3.bf16.msra.mxu0 %v495_v15 }
  0x5e   :  { %460 = vmatprep.subr.bf16.mxu0 %v625_v0 }
  0x60   :  { %445 = vmatpush3.bf16.msra.mxu1 %v490_v10 }
  0x61   :  { %446 = vmatprep.subr.bf16.mxu1 %v625_v0  ;;  %461 = vmatpush3.bf16.msra.mxu0 %v496_v16 }
  0x62   :  { %462 = vmatprep.subr.bf16.mxu0 %v625_v0 }
  0x64   :  { %447 = vmatpush3.bf16.msra.mxu1 %v491_v11 }
  0x65   :  { %448 = vmatprep.subr.bf16.mxu1 %v625_v0  ;;  %463 = vmatpush3.bf16.msra.mxu0 %v497_v17 }
  0x66   :  { %464 = vmatprep.subr.bf16.mxu0 %v625_v0 }
  0x68   :  { %449 = vmatpush3.bf16.msra.mxu1 %v492_v12 }
  0x69   :  { %465 = vmatpush3.bf16.msra.mxu0 %v498_v18 }
  0x6a   :  { %466 = vmatprep.subr.bf16.mxu0 %v625_v0 }
  0x6d   :  { %467 = vmatpush3.bf16.msra.mxu0 %v499_v27 }
  0x6e   :  { %468 = vmatprep.subr.bf16.mxu0 %v625_v0 }
  0x71   :  { %469 = vmatpush3.bf16.msra.mxu0 %v500_v28 }
 0x126   :  { %v138_v20 = vpop.f32.mrb[0].mxu0 }
 0x127   :  { %v139_v21 = vadd.f32 %v383_v19, %v138_v20  ;;  %v432_v22 = vpop.f32.mrb[1].mxu0 }
 0x128   :  { %v141_v23 = vpop.f32.mrb[2].mxu0 }
 0x129   :  { %v144_v24 = vmax.f32 %v139_v21, 0.0  ;;  %v433_v25 = vpop.f32.mrb[3].mxu0 }
 0x12b   :  { %v145_v26 = vpack.c.bf16 %v144_v24, %v144_v24 }
 0x12d   :  { %451 = vmatmul.mubr.bf16.vlgmr.msra.gmra.mrb[0].mxu1 %v145_v26 }
 0x200   :  { %v248_v30 = vpop.f32.mrb[0].mxu1 }
 0x201   :  { %v249_v31 = vadd.f32 %v387_v29, %v248_v30  ;;  %v452_v32 = vpop.f32.mrb[1].mxu1 }
 0x202   :  { %v251_v33 = vpop.f32.mrb[2].mxu1 }
 0x203   :  { %v254_v34 = vmax.f32 %v249_v31, 0.0  ;;  %v453_v35 = vpop.f32.mrb[3].mxu1 }
 0x205   :  { %v255_v36 = vpack.c.bf16 %v254_v34, %v254_v34 }
 0x207   :  { %471 = vmatmul.mubr.bf16.vlgmr.msra.gmra.mrb[4].mxu0 %v255_v36 }
 0x2da   :  { %v358_v38 = vpop.f32.mrb[4].mxu0 }
 0x2db   :  { %v359_v39 = vadd.f32 %v396_v37, %v358_v38  ;;  %v472_v40 = vpop.f32.mrb[5].mxu0 }
 0x2dc   :  { %v361_v41 = vpop.f32.mrb[6].mxu0 }
 0x2dd   :  { %v473_v42 = vpop.f32.mrb[7].mxu0  ;;  %365 = vst.msk [vmem:[#allocation10] sm:$0xff] %vm364_vm2, %v359_v39 }
 0x2de   :  { %600 = shalt.err (!%p597_p8)
}
 0x2df   :  { %s601_s4 = scalar_lea.hbm %s765_s5, 128 }
 0x2e0   :  { %p602_p9 = scmp.ne.s32.totalorder %s765_s5, %s601_s4  ;;  %p605_p10 = scmp.lt.u32.totalorder %s601_s4, %s765_s5 }
 0x2e2   :  { %p607_p11 = pnand %p605_p10, %p602_p9 }
 0x2e4   :  { %610 = shalt.err (!%p607_p11)
}
 0x2e5   :  { %375 = dma.vmem_to_hbm [thread:$0]  %s373_s20, 128, %s765_s5, [#allocation4]  }
 0x2e6   :  { %617 = dma.done.wait [#allocation4], 128  }
 0x2e7   :  { %618 = vsyncadd [#allocation4], 4294967168 }
 0x2e8   :  { %379 = vsyncpa [#allocation3], 1 }
 0x2e9   :  { %380 = vsyncpa [#allocation6], 1 }
 0x2ea   :  { %381 = vsyncpa [#allocation9], 1 }
 0x2eb   :  { %382 = vsyncpa [#allocation4], 1 }

</bundles_post_ra>
